<compile_context>
chip_gen: v7x
topology: tpu7x:2x2x1
jax: 0.10.0
libtpu: 0.0.40
codegen_flags: <defaults>
</compile_context>

<pallas_src>
import functools

import jax
import jax.numpy as jnp
from jax.experimental import pallas as pl
from jax.experimental.pallas import tpu as pltpu


# ------------------------------------------------------------------------- kernels
def _shakedrop_train_kernel(alpha_ref, x_ref, o_ref):
    # alpha_ref: VMEM (TN, 1) float32 per-row effective scale (gate already folded in)
    # x_ref/o_ref: VMEM (TN, TD) in x.dtype; product computed in f32 then cast.
    o_ref[...] = (alpha_ref[...] * x_ref[...]).astype(o_ref.dtype)


def _shakedrop_eval_kernel(x_ref, o_ref, *, scale):
    # Eval: out = (1 - p_drop) * x with a compile-time constant scale (no alpha DMA).
    o_ref[...] = (jnp.float32(scale) * x_ref[...]).astype(o_ref.dtype)


# --------------------------------------------------------------- helpers / tuning
def _tile_budget_and_vmem_limit():
    """Generation-aware per-x-tile byte budget (double-buffered in+out ~= 4x tile)."""
    budget, vmem_limit = 2 << 20, None          # v5e / unknown: 16 MiB scoped default
    try:
        kind = jax.devices()[0].device_kind.lower()
    except Exception:
        kind = ""
    if "v7" in kind:
        budget, vmem_limit = 6 << 20, 48 << 20  # 64 MiB physical VMEM -> leave headroom
    elif "v6" in kind:
        budget = 4 << 20                        # fits the 32 MiB scoped default
    return budget, vmem_limit


def _choose_tiles(rows, cols, itemsize, budget_bytes):
    # Sublane tile: full rows when small (a full-dim block is always legal), else a
    # packing-friendly multiple of 32; ragged boundary handled by the cdiv grid.
    tn = rows if rows <= 256 else 256
    # Lane tile: take the full feature dim when it fits the budget (legal even when
    # cols % 128 != 0); otherwise a multiple of 128 with a masked boundary block.
    if cols * tn * itemsize <= budget_bytes:
        td = cols
    else:
        td = max(128, (budget_bytes // (tn * itemsize)) // 128 * 128)
    return tn, td


def _fold_factor(n, d, itemsize):
    """Fold factor k: reshape (n, d) -> (n*k, d//k) so sublanes are dense for tiny n."""
    row_mult = 8 if itemsize >= 4 else 16
    if n >= 16 or n % row_mult == 0 or d % 128 != 0:
        return 1
    best = 1
    limit = min(d, max(1, 1024 // n))
    for k in range(2, limit + 1):
        if d % k or (d // k) % 128 or (n * k) % row_mult:
            continue
        best = k
    return best


def _effective_alpha(key, n, *, p_drop, alpha_range):
    """Per-sample f32 scale with the scalar Bernoulli gate folded in (training mode)."""
    kg, ka = jax.random.split(key)
    gate = jax.random.bernoulli(kg, 1.0 - p_drop)   # single scalar gate (as in PyTorch)
    alpha = jax.random.uniform(
        ka, (n, 1), minval=alpha_range[0], maxval=alpha_range[1], dtype=jnp.float32
    )
    # gate == 1 -> pass-through (scale 1.0); gate == 0 -> per-sample alpha
    return jnp.where(gate, jnp.ones_like(alpha), alpha)


# -------------------------------------------------------------------------- wrapper
def shake_drop(x, key=None, *, training=True, p_drop=0.5, alpha_range=(-1.0, 1.0),
               donate_x=False):
    """Pallas implementation of ShakeDrop.forward (forward pass only).

    x: (N, C, H, W) float32/bfloat16 (NCHW, like the PyTorch module).
    """
    # TODO(synk): true ShakeDrop backward uses an independent beta ~ U(0,1); add a
    # custom_vjp if this forward is ever differentiated during training.
    n = x.shape[0]
    d = 1
    for s in x.shape[1:]:
        d *= s
    itemsize = jnp.dtype(x.dtype).itemsize

    # Tiny-batch sublane fold (no-op when n is large or d is not 128-aligned).
    k = _fold_factor(n, d, itemsize)
    rows, cols = n * k, d // k
    x2 = x.reshape(rows, cols)

    budget, vmem_limit = _tile_budget_and_vmem_limit()
    tn, td = _choose_tiles(rows, cols, itemsize, budget)
    grid = (pl.cdiv(rows, tn), pl.cdiv(cols, td))

    compiler_params = pltpu.CompilerParams(
        dimension_semantics=("parallel", "parallel"),
        vmem_limit_bytes=vmem_limit,
    )
    x_spec = pl.BlockSpec((tn, td), lambda i, j: (i, j))
    bytes_accessed = 2 * rows * cols * itemsize

    if training:
        if key is None:
            raise ValueError("shake_drop(training=True) requires a PRNG key")
        alpha = _effective_alpha(key, n, p_drop=p_drop, alpha_range=alpha_range)
        if k > 1:
            alpha = jnp.repeat(alpha, k, axis=0)          # (rows, 1), constant per sample
        out2 = pl.pallas_call(
            _shakedrop_train_kernel,
            out_shape=jax.ShapeDtypeStruct((rows, cols), x.dtype),
            grid=grid,
            in_specs=[
                pl.BlockSpec((tn, 1), lambda i, j: (i, 0)),  # re-used across j steps
                x_spec,
            ],
            out_specs=x_spec,
            compiler_params=compiler_params,
            cost_estimate=pl.CostEstimate(
                flops=rows * cols,
                transcendentals=0,
                bytes_accessed=bytes_accessed + rows * 4,
            ),
            input_output_aliases=({1: 0} if donate_x else {}),
        )(alpha, x2)
    else:
        out2 = pl.pallas_call(
            functools.partial(_shakedrop_eval_kernel, scale=1.0 - p_drop),
            out_shape=jax.ShapeDtypeStruct((rows, cols), x.dtype),
            grid=grid,
            in_specs=[x_spec],
            out_specs=x_spec,
            compiler_params=compiler_params,
            cost_estimate=pl.CostEstimate(
                flops=rows * cols,
                transcendentals=0,
                bytes_accessed=bytes_accessed,
            ),
            input_output_aliases=({0: 0} if donate_x else {}),
        )(x2)

    return out2.reshape(x.shape)


# ------------------------------------------------------------------------ reference
def _reference(x, key, *, training, p_drop=0.5, alpha_range=(-1.0, 1.0)):
    """Pure-JAX reference matching the PyTorch ShakeDropFunction.forward."""
    if not training:
        return ((1.0 - p_drop) * x.astype(jnp.float32)).astype(x.dtype)
    n = x.shape[0]
    a = _effective_alpha(key, n, p_drop=p_drop, alpha_range=alpha_range)
    a = a.reshape((n,) + (1,) * (x.ndim - 1))
    return (a * x).astype(x.dtype)


if __name__ == "__main__":
    key = jax.random.PRNGKey(0)
    kx, kdrop = jax.random.split(key)

    # Small NCHW input consistent with what the module's forward expects.
    x = jax.random.normal(kx, (2, 4, 16, 16), dtype=jnp.float32)

    # Training-mode forward (stochastic gate + per-sample alpha) vs pure-JAX reference.
    y_train = jax.block_until_ready(
        shake_drop(x, kdrop, training=True, p_drop=0.5, alpha_range=(-1.0, 1.0)))
    ref_train = _reference(x, kdrop, training=True, p_drop=0.5, alpha_range=(-1.0, 1.0))
    assert y_train.shape == x.shape and y_train.dtype == x.dtype
    assert jnp.allclose(y_train, ref_train, atol=1e-6), "training path mismatch"

    # Eval-mode forward: deterministic, must equal (1 - p_drop) * x.
    y_eval = jax.block_until_ready(shake_drop(x, kdrop, training=False, p_drop=0.5))
    assert jnp.allclose(y_eval, 0.5 * x, atol=1e-6), "eval path mismatch"

    # Ragged-lane case: C*H*W = 147 (not a multiple of 128) — now no pad/slice traffic.
    x_r = jax.random.normal(kx, (2, 3, 7, 7), dtype=jnp.float32)
    y_r = jax.block_until_ready(
        shake_drop(x_r, kdrop, training=True, p_drop=0.5, alpha_range=(-1.0, 1.0)))
    ref_r = _reference(x_r, kdrop, training=True, p_drop=0.5, alpha_range=(-1.0, 1.0))
    assert jnp.allclose(y_r, ref_r, atol=1e-6), "ragged-lane path mismatch"

    # bf16 path: alpha stays f32 in-kernel, only the product is cast to bf16.
    x_b = jax.random.normal(kx, (2, 4, 16, 16), dtype=jnp.bfloat16)
    y_b = jax.block_until_ready(
        shake_drop(x_b, kdrop, training=True, p_drop=0.5, alpha_range=(-1.0, 1.0)))
    ref_b = _reference(x_b, kdrop, training=True, p_drop=0.5, alpha_range=(-1.0, 1.0))
    assert jnp.allclose(y_b.astype(jnp.float32), ref_b.astype(jnp.float32),
                        atol=1e-2), "bf16 path mismatch"

    print("KERNEL_OK")
</pallas_src>

<mosaic_0001>
module attributes {stable_mosaic.version = 11 : i64} {
  func.func @_shakedrop_train_kernel(%arg0: i32, %arg1: i32, %arg2: memref<16x1xf32, #tpu.memory_space<vmem>>, %arg3: memref<16x128xf32, #tpu.memory_space<vmem>>, %arg4: memref<16x128xf32, #tpu.memory_space<vmem>>) attributes {dimension_semantics = [#tpu.dimension_semantics<parallel>, #tpu.dimension_semantics<parallel>], iteration_bounds = array<i64: 1, 1>, scalar_prefetch = 0 : i64, scratch_operands = 0 : i64, tpu.core_type = #tpu.core_type<tc>, window_params = [{transform_indices = @transform_0, window_bounds = array<i64: 16, 1>}, {transform_indices = @transform_1, window_bounds = array<i64: 16, 128>}, {transform_indices = @transform_2, window_bounds = array<i64: 16, 128>}]} {
    %c0 = arith.constant 0 : index
    %c0_0 = arith.constant 0 : index
    %0 = vector.load %arg2[%c0, %c0_0] : memref<16x1xf32, #tpu.memory_space<vmem>>, vector<16x1xf32>
    %c0_1 = arith.constant 0 : index
    %c0_2 = arith.constant 0 : index
    %1 = vector.load %arg3[%c0_1, %c0_2] : memref<16x128xf32, #tpu.memory_space<vmem>>, vector<16x128xf32>
    %2 = vector.broadcast %0 : vector<16x1xf32> to vector<16x128xf32>
    %3 = arith.mulf %2, %1 : vector<16x128xf32>
    %c0_3 = arith.constant 0 : index
    %c0_4 = arith.constant 0 : index
    %4 = vector.load %arg4[%c0_3, %c0_4] : memref<16x128xf32, #tpu.memory_space<vmem>>, vector<16x128xf32>
    tpu.vector_store %arg4[%c0_3, %c0_4], %3 {strides = array<i32>} : memref<16x128xf32, #tpu.memory_space<vmem>>, vector<16x128xf32>,
    return
  }
  func.func @transform_0(%arg0: i32, %arg1: i32) -> (i32, i32) {
    %c0_i32 = arith.constant 0 : i32
    %c0_i32_0 = arith.constant 0 : i32
    return %arg0, %c0_i32 : i32, i32
  }
  func.func @transform_1(%arg0: i32, %arg1: i32) -> (i32, i32) {
    %c0_i32 = arith.constant 0 : i32
    return %arg0, %arg1 : i32, i32
  }
  func.func @transform_2(%arg0: i32, %arg1: i32) -> (i32, i32) {
    %c0_i32 = arith.constant 0 : i32
    return %arg0, %arg1 : i32, i32
  }
}

</mosaic_0001>

<bundles_post_ra>
// kernel: tpu_custom_call.1
= control target key start
LH: loop header
LB: loop body
LE: loop exit
PB: predicated region body
PF: predicated region fallthrough
CT: control target
= control target key end

     0   :  { %v75_v1 = vmov 0   ;;  %s118_s0 = inlined_call_operand.vmem [shape: f32[16,1], index: 0, kind: input, shape index: {}]   ;;  %s119_s1 = inlined_call_operand.vmem [shape: f32[16,128], index: 1, kind: input, shape index: {}]   ;;  %s120_s2 = inlined_call_operand.hbm [shape: f32[16,128], index: 2, kind: output, shape index: {}]  }
   0x1   :  { %v12_v0 = vld [vmem:[%s118_s0] sm:$0xff]  ;;  %50 = vset.pattern.permute.xlu0 %v75_v1 }
   0x2   :  { %7 = vsyncpa [#allocation3], 0  ;;  %18 = vperm.xlu0 %50, %v12_v0   ;;  %v13_v2 = vld [vmem:[%s118_s0 + $0x8] sm:$0xff]  ;;  %v14_v3 = vld [vmem:[%s119_s1] sm:$0xff]  ;;  %s76_s15 = smov [#allocation2]  }
   0x3   :  { %s35_s16 = sshll.u32 %s76_s15, 4  ;;  %v15_v6 = vld [vmem:[%s119_s1 + $0x8] sm:$0xff]  ;;  %s36_s16 = int_to_ptr.vmem [resolvable:$true] %s35_s16 }
   0x4   :  { %s51_s19 = scalar_lea.vmem %s36_s16, 256  ;;  %p56_p1 = scmp.lt.s32.totalorder %s36_s16, %s36_s16 }
   0x5   :  { %p52_p0 = scmp.ne.s32.totalorder %s36_s16, %s51_s19  ;;  %p57_p2 = scmp.lt.s32.totalorder %s51_s19, %s51_s19 }
   0x6   :  { %23 = vperm.xlu0 %50, %v13_v2  }
   0x7   :  { %p58_p3 = por %p57_p2, %p56_p1 }
   0x9   :  { %p59_p4 = pnand %p58_p3, %p52_p0 }
  0x81   :  { %v19_v4 = vpop.permute.xlu0 %18 }
  0x82   :  { %v26_v5 = vmul.f32 %v19_v4, %v14_v3 }
  0x84   :  { %28 = vst [vmem:[#allocation2] sm:$0xff] %v26_v5 }
  0x85   :  { %v24_v7 = vpop.permute.xlu0 %23 }
  0x86   :  { %v27_v8 = vmul.f32 %v24_v7, %v15_v6 }
  0x88   :  { %29 = vst [vmem:[#allocation2 + $0x8] sm:$0xff] %v27_v8 }
  0x89   :  { %62 = shalt.err (!%p59_p4)
}
  0x8a   :  { %s63_s21 = scalar_lea.hbm %s120_s2, 256 }
  0x8b   :  { %p64_p5 = scmp.ne.s32.totalorder %s120_s2, %s63_s21  ;;  %p67_p6 = scmp.lt.u32.totalorder %s63_s21, %s120_s2 }
  0x8d   :  { %p69_p7 = pnand %p67_p6, %p64_p5 }
  0x8f   :  { %72 = shalt.err (!%p69_p7)
}
  0x90   :  { %s77_s25 = smov 128   ;;  %s78_s26 = smov 8  }
  0x91   :  { %41 = dma.vmem_to_hbm [thread:$0]  %s36_s16, 256, %s120_s2, [#allocation3], %s77_s25, %s77_s25, %s78_s26  }
  0x92   :  { %73 = dma.done.wait [#allocation3], 256  }
  0x93   :  { %74 = vsyncadd [#allocation3], 4294967040 }
  0x94   :  { %45 = vsyncpa [#allocation3], 1 }

</bundles_post_ra>
